<compile_context>
chip_gen: v7x
topology: tpu7x:2x2x1
jax: 0.10.0
libtpu: 0.0.40
codegen_flags: <defaults>
</compile_context>

<pallas_src>
import jax
import jax.numpy as jnp
from jax.experimental import pallas as pl
from jax.experimental.pallas import tpu as pltpu

SMOOTH = 1e-5


def _dice_stats_kernel(pred_ref, tgt_ref, inter_ref, union_ref):
    """Accumulates per-(N, C) dice statistics over spatial tiles.

    pred_ref  : (N, C, TS) logits tile (input dtype; upcast to f32 in-kernel)
    tgt_ref   : (N, TS)    int8/int32 class-id tile
    inter_ref : (1, N, C)  f32 accumulator (resident across the spatial axis)
    union_ref : (1, N, C)  f32 accumulator = sum(softmax^2) + sum(onehot)
    """
    s = pl.program_id(1)

    @pl.when(s == 0)
    def _():
        inter_ref[...] = jnp.zeros_like(inter_ref)
        union_ref[...] = jnp.zeros_like(union_ref)

    p = pred_ref[...].astype(jnp.float32)        # (N, C, TS)
    t = tgt_ref[...].astype(jnp.int32)           # (N, TS)

    # Numerically stable softmax over the channel axis; reciprocal + multiply
    # instead of a per-element divide (exact, so the 1e-5 smoothing still
    # matches the reference to float tolerance).
    m = jnp.max(p, axis=1, keepdims=True)        # (N, 1, TS)
    e = jnp.exp(p - m)
    inv = pl.reciprocal(jnp.sum(e, axis=1, keepdims=True))   # (N, 1, TS)
    sm = e * inv

    # One-hot(target) along channels without a scatter: compare against iota.
    ch = jax.lax.broadcasted_iota(jnp.int32, p.shape, 1)     # (N, C, TS)
    oh = (ch == t[:, None, :]).astype(jnp.float32)

    # Spatial (lane-axis) reductions -> (N, C) partials, accumulate.
    inter_ref[...] += jnp.sum(sm * oh, axis=2)[None]
    union_ref[...] += jnp.sum(sm * sm + oh, axis=2)[None]


def _pick_spatial_tile(S, bytes_per_pos, budget_bytes, max_tile):
    """Largest 128-multiple divisor of S whose double-buffered input blocks
    fit the VMEM budget; falls back to the whole spatial axis (always a legal
    block) when no such divisor exists."""
    best = None
    t = 128
    while t <= min(S, max_tile):
        if S % t == 0 and 2 * t * bytes_per_pos <= budget_bytes:
            best = t
        t += 128
    if best is None:
        # TODO(synk): for very large S that is not a multiple of 128, pad the
        # spatial axis and mask the tail instead of taking one giant block.
        best = S
    return best


@jax.jit
def dice_loss(predict, target, weight=None):
    """Pallas implementation of DiceLoss.forward.

    predict: (N, C, *spatial) float logits (any float dtype; computed in f32)
    target : (N, 1, *spatial) or (N, *spatial) integer class ids in [0, C)
    weight : optional per-class weights (length C); normalized like the module.
    """
    N, C = predict.shape[:2]
    pred = predict.reshape(N, C, -1)                 # keep input dtype (bf16 stays bf16)
    tgt_dtype = jnp.int8 if C <= 127 else jnp.int32  # shrink the target HBM stream
    tgt = target.reshape(N, -1).astype(tgt_dtype)
    S = pred.shape[-1]

    bytes_per_pos = (N * C * jnp.dtype(pred.dtype).itemsize
                     + N * jnp.dtype(tgt_dtype).itemsize)
    tile = _pick_spatial_tile(S, bytes_per_pos,
                              budget_bytes=12 * 1024 * 1024, max_tile=4096)
    num_tiles = S // tile if S % tile == 0 else 1

    # v7x megacore: split spatial tile groups across the 2 TensorCores when
    # possible; on v5e/v6e (or with a single tile) this degrades to P = 1.
    P = 2 if (num_tiles >= 2 and num_tiles % 2 == 0) else 1
    K = num_tiles // P

    inter_p, union_p = pl.pallas_call(
        _dice_stats_kernel,
        out_shape=(
            jax.ShapeDtypeStruct((P, N, C), jnp.float32),
            jax.ShapeDtypeStruct((P, N, C), jnp.float32),
        ),
        grid_spec=pltpu.PrefetchScalarGridSpec(
            num_scalar_prefetch=0,
            grid=(P, K),
            in_specs=[
                pl.BlockSpec((N, C, tile), lambda p, s: (0, 0, p * K + s)),
                pl.BlockSpec((N, tile), lambda p, s: (0, p * K + s)),
            ],
            out_specs=[
                pl.BlockSpec((1, N, C), lambda p, s: (p, 0, 0)),
                pl.BlockSpec((1, N, C), lambda p, s: (p, 0, 0)),
            ],
        ),
        compiler_params=pltpu.CompilerParams(
            dimension_semantics=("parallel", "arbitrary"),
            vmem_limit_bytes=32 * 1024 * 1024,
        ),
    )(pred, tgt)

    inter = jnp.sum(inter_p, axis=0)                 # (N, C)
    union = jnp.sum(union_p, axis=0)                 # (N, C)
    dice_coef = (2.0 * inter + SMOOTH) / (union + SMOOTH)
    if weight is not None:
        w = jnp.asarray(weight, jnp.float32)
        w = w / jnp.sum(w)
        dice_coef = dice_coef * w * C
    return 1.0 - jnp.mean(dice_coef)


def dice_loss_ref(predict, target):
    """Pure-JAX reference mirroring the PyTorch module (no weight)."""
    N, C = predict.shape[:2]
    p = jax.nn.softmax(predict.reshape(N, C, -1).astype(jnp.float32), axis=1)
    t = target.reshape(N, -1)
    oh = jax.nn.one_hot(t, C, axis=1, dtype=jnp.float32)       # (N, C, S)
    inter = jnp.sum(p * oh, axis=2)
    union = jnp.sum(p * p, axis=2) + jnp.sum(oh, axis=2)
    dice = (2.0 * inter + SMOOTH) / (union + SMOOTH)
    return 1.0 - jnp.mean(dice)


if __name__ == "__main__":
    # Small shapes consistent with the module: batch=2, channels=4, spatial=16x16.
    N, C, H, W = 2, 4, 16, 16
    key = jax.random.PRNGKey(0)
    k_pred, k_tgt = jax.random.split(key)
    predict = jax.random.normal(k_pred, (N, C, H, W), dtype=jnp.float32)
    target = jax.random.randint(k_tgt, (N, 1, H, W), 0, C, dtype=jnp.int32)

    loss = dice_loss(predict, target)
    loss = jax.block_until_ready(loss)

    ref = jax.block_until_ready(dice_loss_ref(predict, target))
    assert jnp.allclose(loss, ref, atol=1e-5, rtol=1e-5), (loss, ref)

    print("KERNEL_OK")
</pallas_src>

<mosaic_0001>
module attributes {stable_mosaic.version = 11 : i64} {
  func.func @_dice_stats_kernel(%arg0: i32, %arg1: i32, %arg2: memref<2x4x256xf32, #tpu.memory_space<vmem>>, %arg3: memref<2x256xi8, #tpu.memory_space<vmem>>, %arg4: memref<1x2x4xf32, #tpu.memory_space<vmem>>, %arg5: memref<1x2x4xf32, #tpu.memory_space<vmem>>) attributes {dimension_semantics = [#tpu.dimension_semantics<parallel>, #tpu.dimension_semantics<arbitrary>], iteration_bounds = array<i64: 1, 1>, scalar_prefetch = 0 : i64, scratch_operands = 0 : i64, tpu.core_type = #tpu.core_type<tc>, window_params = [{transform_indices = @transform_0, window_bounds = array<i64: 2, 4, 256>}, {transform_indices = @transform_1, window_bounds = array<i64: 2, 256>}, {transform_indices = @transform_2, window_bounds = array<i64: 1, 2, 4>}, {transform_indices = @transform_3, window_bounds = array<i64: 1, 2, 4>}]} {
    %c0_i32 = arith.constant 0 : i32
    %0 = arith.cmpi eq, %arg1, %c0_i32 : i32
    %1 = arith.extui %0 : i1 to i32
    %c0_i32_0 = arith.constant 0 : i32
    %2 = arith.cmpi ne, %1, %c0_i32_0 : i32
    scf.if %2 {
      %cst_20 = arith.constant 0.000000e+00 : f32
      %35 = vector.broadcast %cst_20 : f32 to vector<1x2x4xf32>
      %c0_21 = arith.constant 0 : index
      %c0_22 = arith.constant 0 : index
      %c0_23 = arith.constant 0 : index
      %36 = vector.load %arg4[%c0_21, %c0_22, %c0_23] : memref<1x2x4xf32, #tpu.memory_space<vmem>>, vector<1x2x4xf32>
      tpu.vector_store %arg4[%c0_21, %c0_22, %c0_23], %35 {strides = array<i32>} : memref<1x2x4xf32, #tpu.memory_space<vmem>>, vector<1x2x4xf32>,
      %cst_24 = arith.constant 0.000000e+00 : f32
      %37 = vector.broadcast %cst_24 : f32 to vector<1x2x4xf32>
      %c0_25 = arith.constant 0 : index
      %c0_26 = arith.constant 0 : index
      %c0_27 = arith.constant 0 : index
      %38 = vector.load %arg5[%c0_25, %c0_26, %c0_27] : memref<1x2x4xf32, #tpu.memory_space<vmem>>, vector<1x2x4xf32>
      tpu.vector_store %arg5[%c0_25, %c0_26, %c0_27], %37 {strides = array<i32>} : memref<1x2x4xf32, #tpu.memory_space<vmem>>, vector<1x2x4xf32>,
    } else {
    }
    %c0 = arith.constant 0 : index
    %c0_1 = arith.constant 0 : index
    %c0_2 = arith.constant 0 : index
    %3 = vector.load %arg2[%c0, %c0_1, %c0_2] : memref<2x4x256xf32, #tpu.memory_space<vmem>>, vector<2x4x256xf32>
    %c0_3 = arith.constant 0 : index
    %c0_4 = arith.constant 0 : index
    %4 = vector.load %arg3[%c0_3, %c0_4] : memref<2x256xi8, #tpu.memory_space<vmem>>, vector<2x256xi8>
    %5 = arith.extsi %4 : vector<2x256xi8> to vector<2x256xi32>
    %cst = arith.constant dense<0xFF800000> : vector<2x256xf32>
    %6 = vector.multi_reduction <maximumf>, %3, %cst [1] : vector<2x4x256xf32> to vector<2x256xf32>
    %7 = vector.shape_cast %6 : vector<2x256xf32> to vector<2x1x256xf32>
    %8 = vector.broadcast %7 : vector<2x1x256xf32> to vector<2x4x256xf32>
    %9 = arith.subf %3, %8 : vector<2x4x256xf32>
    %10 = math.exp %9 : vector<2x4x256xf32>
    %cst_5 = arith.constant dense<0.000000e+00> : vector<2x256xf32>
    %11 = vector.multi_reduction <add>, %10, %cst_5 [1] : vector<2x4x256xf32> to vector<2x256xf32>
    %12 = vector.shape_cast %11 : vector<2x256xf32> to vector<2x1x256xf32>
    %13 = tpu.reciprocal %12 : vector<2x1x256xf32> -> vector<2x1x256xf32>
    %14 = vector.broadcast %13 : vector<2x1x256xf32> to vector<2x4x256xf32>
    %15 = arith.mulf %10, %14 : vector<2x4x256xf32>
    %16 = tpu.iota {dimensions = array<i32: 1>} : vector<2x4x256xi32>
    %17 = vector.shape_cast %5 : vector<2x256xi32> to vector<2x1x256xi32>
    %18 = vector.broadcast %17 : vector<2x1x256xi32> to vector<2x4x256xi32>
    %19 = arith.cmpi eq, %16, %18 : vector<2x4x256xi32>
    %20 = arith.extui %19 : vector<2x4x256xi1> to vector<2x4x256xi32>
    %21 = arith.sitofp %20 : vector<2x4x256xi32> to vector<2x4x256xf32>
    %c0_6 = arith.constant 0 : index
    %c0_7 = arith.constant 0 : index
    %c0_8 = arith.constant 0 : index
    %22 = vector.load %arg4[%c0_6, %c0_7, %c0_8] : memref<1x2x4xf32, #tpu.memory_space<vmem>>, vector<1x2x4xf32>
    %23 = arith.mulf %15, %21 : vector<2x4x256xf32>
    %cst_9 = arith.constant dense<0.000000e+00> : vector<2x4xf32>
    %24 = vector.multi_reduction <add>, %23, %cst_9 [2] : vector<2x4x256xf32> to vector<2x4xf32>
    %25 = vector.shape_cast %24 : vector<2x4xf32> to vector<1x2x4xf32>
    %26 = arith.addf %22, %25 : vector<1x2x4xf32>
    %c0_10 = arith.constant 0 : index
    %c0_11 = arith.constant 0 : index
    %c0_12 = arith.constant 0 : index
    %27 = vector.load %arg4[%c0_10, %c0_11, %c0_12] : memref<1x2x4xf32, #tpu.memory_space<vmem>>, vector<1x2x4xf32>
    tpu.vector_store %arg4[%c0_10, %c0_11, %c0_12], %26 {strides = array<i32>} : memref<1x2x4xf32, #tpu.memory_space<vmem>>, vector<1x2x4xf32>,
    %c0_13 = arith.constant 0 : index
    %c0_14 = arith.constant 0 : index
    %c0_15 = arith.constant 0 : index
    %28 = vector.load %arg5[%c0_13, %c0_14, %c0_15] : memref<1x2x4xf32, #tpu.memory_space<vmem>>, vector<1x2x4xf32>
    %29 = arith.mulf %15, %15 : vector<2x4x256xf32>
    %30 = arith.addf %29, %21 : vector<2x4x256xf32>
    %cst_16 = arith.constant dense<0.000000e+00> : vector<2x4xf32>
    %31 = vector.multi_reduction <add>, %30, %cst_16 [2] : vector<2x4x256xf32> to vector<2x4xf32>
    %32 = vector.shape_cast %31 : vector<2x4xf32> to vector<1x2x4xf32>
    %33 = arith.addf %28, %32 : vector<1x2x4xf32>
    %c0_17 = arith.constant 0 : index
    %c0_18 = arith.constant 0 : index
    %c0_19 = arith.constant 0 : index
    %34 = vector.load %arg5[%c0_17, %c0_18, %c0_19] : memref<1x2x4xf32, #tpu.memory_space<vmem>>, vector<1x2x4xf32>
    tpu.vector_store %arg5[%c0_17, %c0_18, %c0_19], %33 {strides = array<i32>} : memref<1x2x4xf32, #tpu.memory_space<vmem>>, vector<1x2x4xf32>,
    return
  }
  func.func @transform_0(%arg0: i32, %arg1: i32) -> (i32, i32, i32) {
    %c1_i32 = arith.constant 1 : i32
    %0 = arith.muli %arg0, %c1_i32 : i32
    %1 = arith.addi %0, %arg1 : i32
    %c0_i32 = arith.constant 0 : i32
    %c0_i32_0 = arith.constant 0 : i32
    %c0_i32_1 = arith.constant 0 : i32
    return %c0_i32, %c0_i32_0, %1 : i32, i32, i32
  }
  func.func @transform_1(%arg0: i32, %arg1: i32) -> (i32, i32) {
    %c1_i32 = arith.constant 1 : i32
    %0 = arith.muli %arg0, %c1_i32 : i32
    %1 = arith.addi %0, %arg1 : i32
    %c0_i32 = arith.constant 0 : i32
    %c0_i32_0 = arith.constant 0 : i32
    return %c0_i32, %1 : i32, i32
  }
  func.func @transform_2(%arg0: i32, %arg1: i32) -> (i32, i32, i32) {
    %c0_i32 = arith.constant 0 : i32
    %c0_i32_0 = arith.constant 0 : i32
    %c0_i32_1 = arith.constant 0 : i32
    return %arg0, %c0_i32, %c0_i32_0 : i32, i32, i32
  }
  func.func @transform_3(%arg0: i32, %arg1: i32) -> (i32, i32, i32) {
    %c0_i32 = arith.constant 0 : i32
    %c0_i32_0 = arith.constant 0 : i32
    %c0_i32_1 = arith.constant 0 : i32
    return %arg0, %c0_i32, %c0_i32_0 : i32, i32, i32
  }
}

</mosaic_0001>

<bundles_post_ra>
// kernel: dice_loss.1
= control target key start
LH: loop header
LB: loop body
LE: loop exit
PB: predicated region body
PF: predicated region fallthrough
CT: control target
= control target key end

     0   :  { %vm71_vm0 = vcmask 1043456   ;;  %v162_v4 = vlaneseq  ;;  %v331_v42 = vmov 1966171168   ;;  %vm58_vm5 = vcmask 25600   ;;  %s428_s0 = inlined_call_operand.vmem [shape: f32[2,4,256], index: 0, kind: input, shape index: {}]   ;;  %s429_s1 = inlined_call_operand.vmem [shape: s8[2,256], index: 1, kind: input, shape index: {}]   ;;  %s430_s2 = inlined_call_operand.vmem [shape: f32[1,2,4], index: 2, kind: output, shape index: {0}]   ;;  %s431_s3 = inlined_call_operand.vmem [shape: f32[1,2,4], index: 3, kind: output, shape index: {1}]  }
   0x1   :  { %v61_v0 = vld [vmem:[%s428_s0] sm:$0xff]  ;;  %v62_v1 = vld [vmem:[%s428_s0 + $0x8] sm:$0xff]  ;;  %v165_v43 = vunpack.c.l.s4 %v331_v42  ;;  %vm253_vm6 = vcmask 1041409  }
   0x2   :  { %v67_v2 = vcombine.high %v61_v0, %v61_v0  ;;  %v72_v3 = vsel %vm71_vm0, %v61_v0, -inf  ;;  %v68_v6 = vcombine.high %v62_v1, %v62_v1  ;;  %v86_v7 = vsel %vm71_vm0, %v62_v1, -inf  ;;  %v63_v45 = vld [vmem:[%s429_s1] sm:$0x3] }
   0x3   :  { %v73_v5 = vrot.slane %v72_v3, 4  ;;  %v87_v9 = vrot.slane %v86_v7, 4  ;;  %v363_v13 = vshrl.u32 %v162_v4, 7  ;;  %v244_v16 = vand.u32 127, %v162_v4 }
   0x4   :  { %v79_v8 = vsel %vm71_vm0, %v67_v2, -inf  ;;  %v93_v12 = vsel %vm71_vm0, %v68_v6, -inf  ;;  %v166_v46 = vunpack.c.0.s8 %v165_v43  ;;  %v64_v53 = vunpack.c.0.s8 %v63_v45 }
   0x5   :  { %v74_v10 = vmax.f32 %v72_v3, %v73_v5  ;;  %v80_v11 = vrot.slane %v79_v8, 4  ;;  %v88_v14 = vmax.f32 %v86_v7, %v87_v9  ;;  %v94_v15 = vrot.slane %v93_v12, 4 }
   0x6   :  { %v366_v21 = vsub.s32 %v244_v16, %v363_v13  ;;  %v169_v58 = vsub.s32 %v166_v46, %v363_v13 }
   0x7   :  { %v75_v17 = vrot.slane %v74_v10, 2  ;;  %v81_v18 = vmax.f32 %v79_v8, %v80_v11  ;;  %v89_v19 = vrot.slane %v88_v14, 2  ;;  %v95_v20 = vmax.f32 %v93_v12, %v94_v15 }
   0x8   :  { %v170_v4 = vrot.slane %v64_v53, %v169_v58  ;;  %v188_v15 = vsub.s32 0, %v363_v13 }
   0x9   :  { %v76_v22 = vmax.f32 %v74_v10, %v75_v17  ;;  %v82_v23 = vrot.slane %v81_v18, 2  ;;  %v90_v24 = vmax.f32 %v88_v14, %v89_v19  ;;  %v96_v25 = vrot.slane %v95_v20, 2 }
   0xa   :  { %v171_v9 = vcombine.high %v170_v4, %v170_v4  ;;  %v178_v16 = vrot.slane %v170_v4, %v169_v58  ;;  %v192_v17 = vsub.s32 1, %v363_v13 }
   0xb   :  { %v77_v26 = vrot.slane %v76_v22, 1  ;;  %v83_v27 = vmax.f32 %v81_v18, %v82_v23  ;;  %v91_v28 = vrot.slane %v90_v24, 1  ;;  %v97_v29 = vmax.f32 %v95_v20, %v96_v25 }
   0xc   :  { %v193_v25 = vrot.slane %v178_v16, %v192_v17 }
   0xd   :  { %v78_v30 = vmax.f32 %v76_v22, %v77_v26  ;;  %v84_v31 = vrot.slane %v83_v27, 1  ;;  %v92_v32 = vmax.f32 %v90_v24, %v91_v28  ;;  %v98_v33 = vrot.slane %v97_v29, 1 }
   0xe   :  { %v185_v22 = vrot.slane %v171_v9, %v169_v58  ;;  %v189_v24 = vrot.slane %v178_v16, %v188_v15  ;;  %vm203_vm2 = vcmp.eq.s32.totalorder %v363_v13, %v193_v25 }
   0xf   :  { %v85_v34 = vmax.f32 %v83_v27, %v84_v31  ;;  %v99_v35 = vmax.f32 %v97_v29, %v98_v33  ;;  %v332_v29 = vmov 0.0  }
  0x10   :  { %v197_v26 = vrot.slane %v185_v22, %v188_v15  ;;  %v201_v27 = vrot.slane %v185_v22, %v192_v17  ;;  %vm202_vm1 = vcmp.eq.s32.totalorder %v363_v13, %v189_v24  ;;  %v312_v31 = vsel %vm203_vm2, 1.0, %v332_v29  ;;  %59 = vst.msk [vmem:[%s430_s2] sm:$0x3] %vm58_vm5, %v332_v29  ;;  %60 = vst.msk [vmem:[%s431_s3] sm:$0x3] %vm58_vm5, %v332_v29 }
  0x11   :  { %v104_v36 = vcombine.low %v78_v30, %v85_v34  ;;  %v105_v37 = vcombine.low %v92_v32, %v99_v35  ;;  %v311_v30 = vsel %vm202_vm1, 1.0, %v332_v29 }
  0x12   :  { %vm204_vm3 = vcmp.eq.s32.totalorder %v363_v13, %v197_v26  ;;  %vm205_vm4 = vcmp.eq.s32.totalorder %v363_v13, %v201_v27 }
  0x13   :  { %v108_v38 = vsub.f32 %v61_v0, %v104_v36  ;;  %v109_v39 = vsub.f32 %v62_v1, %v105_v37  ;;  %v313_v33 = vsel %vm204_vm3, 1.0, %v332_v29  ;;  %v314_v34 = vsel %vm205_vm4, 1.0, %v332_v29 }
  0x15   :  { %v110_v40 = vmul.f32 1.442695, %v108_v38  ;;  %v112_v41 = vmul.f32 1.442695, %v109_v39  ;;  %v219_v38 = vcombine.low %v311_v30, %v312_v31 }
  0x17   :  { %319 = vpow2.f32 %v110_v40  ;;  %v220_v40 = vcombine.low %v313_v33, %v314_v34  ;;  %v214_v4 = vld [vmem:[%s430_s2] sm:$0x3] }
  0x18   :  { %321 = vpow2.f32 %v112_v41  ;;  %v259_v9 = vld [vmem:[%s431_s3] sm:$0x3] }
  0x21   :  { %v368_v44 = vpop.eup %319 }
  0x22   :  { %v373_v47 = vpop.eup %321  ;;  %v116_v48 = vcombine.high %v368_v44, %v368_v44  ;;  %v120_v49 = vsel %vm71_vm0, %v368_v44, 0.0 }
  0x23   :  { %v121_v50 = vrot.slane %v120_v49, 4  ;;  %v117_v51 = vcombine.high %v373_v47, %v373_v47  ;;  %v134_v52 = vsel %vm71_vm0, %v373_v47, 0.0 }
  0x24   :  { %v127_v54 = vsel %vm71_vm0, %v116_v48, 0.0  ;;  %v135_v55 = vrot.slane %v134_v52, 4 }
  0x25   :  { %v122_v56 = vadd.f32 %v121_v50, %v120_v49  ;;  %v128_v57 = vrot.slane %v127_v54, 4  ;;  %v141_v59 = vsel %vm71_vm0, %v117_v51, 0.0 }
  0x26   :  { %v136_v60 = vadd.f32 %v135_v55, %v134_v52  ;;  %v142_v61 = vrot.slane %v141_v59, 4 }
  0x27   :  { %v123_v62 = vrot.slane %v122_v56, 2  ;;  %v129_v63 = vadd.f32 %v128_v57, %v127_v54 }
  0x28   :  { %v137_v0 = vrot.slane %v136_v60, 2  ;;  %v143_v1 = vadd.f32 %v142_v61, %v141_v59 }
  0x29   :  { %v124_v2 = vadd.f32 %v123_v62, %v122_v56  ;;  %v130_v3 = vrot.slane %v129_v63, 2 }
  0x2a   :  { %v138_v5 = vadd.f32 %v137_v0, %v136_v60  ;;  %v144_v6 = vrot.slane %v143_v1, 2 }
  0x2b   :  { %v125_v7 = vrot.slane %v124_v2, 1  ;;  %v131_v8 = vadd.f32 %v130_v3, %v129_v63 }
  0x2c   :  { %v139_v10 = vrot.slane %v138_v5, 1  ;;  %v145_v11 = vadd.f32 %v144_v6, %v143_v1 }
  0x2d   :  { %v126_v12 = vadd.f32 %v125_v7, %v124_v2  ;;  %v132_v14 = vrot.slane %v131_v8, 1 }
  0x2e   :  { %v140_v18 = vadd.f32 %v139_v10, %v138_v5  ;;  %v146_v19 = vrot.slane %v145_v11, 1 }
  0x2f   :  { %v133_v20 = vadd.f32 %v132_v14, %v131_v8  ;;  %323 = vrcp.f32 %v126_v12 }
  0x30   :  { %v147_v23 = vadd.f32 %v146_v19, %v145_v11  ;;  %325 = vrcp.f32 %v140_v18 }
  0x31   :  { %327 = vrcp.f32 %v133_v20 }
  0x32   :  { %329 = vrcp.f32 %v147_v23 }
  0x39   :  { %v324_v28 = vpop.eup %323 }
  0x3a   :  { %v326_v32 = vpop.eup %325 }
  0x3b   :  { %v328_v35 = vpop.eup %327 }
  0x3c   :  { %v330_v36 = vpop.eup %329  ;;  %v156_v37 = vcombine.low %v324_v28, %v328_v35 }
  0x3d   :  { %v157_v39 = vcombine.low %v326_v32, %v330_v36 }
  0x3e   :  { %v160_v41 = vmul.f32 %v368_v44, %v156_v37 }
  0x3f   :  { %v161_v42 = vmul.f32 %v373_v47, %v157_v39 }
  0x40   :  { %v223_v43 = vmul.f32 %v219_v38, %v160_v41  ;;  %v260_v45 = vmul.f32 %v160_v41, %v160_v41 }
  0x41   :  { %v224_v13 = vmul.f32 %v220_v40, %v161_v42  ;;  %v261_v46 = vmul.f32 %v161_v42, %v161_v42 }
  0x42   :  { %v227_v48 = vcombine.high %v223_v43, %v223_v43  ;;  %v231_v49 = vsel %vm71_vm0, %v223_v43, 0.0  ;;  %v262_v50 = vadd.f32 %v260_v45, %v219_v38 }
  0x43   :  { %v228_v51 = vcombine.high %v224_v13, %v224_v13  ;;  %v263_v52 = vadd.f32 %v261_v46, %v220_v40  ;;  %v236_v56 = vsel %vm71_vm0, %v224_v13, 0.0 }
  0x44   :  { %v232_v53 = vsel %vm71_vm0, %v227_v48, 0.0  ;;  %v266_v54 = vcombine.high %v262_v50, %v262_v50  ;;  %v270_v55 = vsel %vm71_vm0, %v262_v50, 0.0 }
  0x45   :  { %v233_v44 = vadd.f32 %v232_v53, %v231_v49  ;;  %v237_v47 = vsel %vm71_vm0, %v228_v51, 0.0  ;;  %v267_v57 = vcombine.high %v263_v52, %v263_v52  ;;  %v275_v59 = vsel %vm71_vm0, %v263_v52, 0.0 }
  0x46   :  { %v271_v58 = vsel %vm71_vm0, %v266_v54, 0.0  ;;  %v238_v61 = vadd.f32 %v237_v47, %v236_v56 }
  0x47   :  { %234 = vadd.xlane.f32.xlu0 %v233_v44  ;;  %v272_v60 = vadd.f32 %v271_v58, %v270_v55  ;;  %v276_v62 = vsel %vm71_vm0, %v267_v57, 0.0 }
  0x48   :  { %v277_v63 = vadd.f32 %v276_v62, %v275_v59 }
  0x49   :  { %273 = vadd.xlane.f32.xlu1 %v272_v60 }
  0x4b   :  { %239 = vadd.xlane.f32.xlu0 %v238_v61 }
  0x4d   :  { %278 = vadd.xlane.f32.xlu1 %v277_v63 }
  0xd4   :  { %v235_v0 = vpop.xlane.xlu0 %234 }
  0xd5   :  { %v248_v3 = vrot.slane %v235_v0, %v366_v21 }
  0xd6   :  { %v274_v1 = vpop.xlane.xlu1 %273 }
  0xd7   :  { %v285_v7 = vrot.slane %v274_v1, %v366_v21 }
  0xd8   :  { %v240_v2 = vpop.xlane.xlu0 %239 }
  0xd9   :  { %v252_v5 = vrot.slane %v240_v2, %v366_v21 }
  0xda   :  { %v279_v6 = vpop.xlane.xlu1 %278 }
  0xdb   :  { %v254_v8 = vsel %vm253_vm6, %v252_v5, %v248_v3  ;;  %v289_v10 = vrot.slane %v279_v6, %v366_v21 }
  0xdc   :  { %v256_v11 = vadd.f32 %v254_v8, %v214_v4 }
  0xdd   :  { %v290_v12 = vsel %vm253_vm6, %v289_v10, %v285_v7 }
  0xde   :  { %258 = vst.msk [vmem:[%s430_s2] sm:$0x3] %vm58_vm5, %v256_v11  ;;  %v292_v14 = vadd.f32 %v290_v12, %v259_v9 }
  0xe0   :  { %293 = vst.msk [vmem:[%s431_s3] sm:$0x3] %vm58_vm5, %v292_v14 }

</bundles_post_ra>
